<compile_context>
chip_gen: v7x
topology: tpu7x:2x2x1
jax: 0.10.0
libtpu: 0.0.40
codegen_flags: <defaults>
</compile_context>

<pallas_src>
import math
import jax
import jax.numpy as jnp
from jax.experimental import pallas as pl
from jax.experimental.pallas import tpu as pltpu

# ---- small config (mirrors LMConfig semantics) ----
BATCH = 2
SEQ = 8
DIM = 64
N_HEADS = 4
N_KV_HEADS = 2
HEAD_DIM = DIM // N_HEADS                  # 16
N_REP = N_HEADS // N_KV_HEADS              # 2
MULTIPLE_OF = 64
HIDDEN = MULTIPLE_OF * ((int(2 * (4 * DIM) / 3) + MULTIPLE_OF - 1) // MULTIPLE_OF)  # 192
EPS = 1e-5
ROPE_THETA = 1e6
DQ = N_HEADS * HEAD_DIM                    # 64
DKV = N_KV_HEADS * HEAD_DIM                # 32
QKV_W = DQ + 2 * DKV                       # 128  (lane-dense packed q|k|v width)


# ---------------------------------------------------------------------------
# Fused block kernel: one grid step = one batch element, everything in VMEM.
# ---------------------------------------------------------------------------
def _block_kernel(x_ref, anorm_ref, fnorm_ref, wqkv_ref, wo_ref,
                  w1_ref, w3_ref, w2_ref, cos_ref, sin_ref, o_ref):
    x = x_ref[0]                                              # (S, D)
    S, D = x.shape

    # ---- RMSNorm (attention_norm) ----
    xn = (x * jax.lax.rsqrt(jnp.mean(x * x, axis=-1, keepdims=True) + EPS)) * anorm_ref[...]

    # ---- fused q|k|v projection: single lane-dense (S, 128) matmul ----
    qkv = jnp.dot(xn, wqkv_ref[...], preferred_element_type=jnp.float32)

    # ---- RoPE via XLU rolls: swap adjacent (re, im) pairs, then x*cos + swap(x)*sin.
    #      The v columns of cos/sin are 1/0, so v passes through unchanged.
    W = qkv.shape[-1]
    lane = jax.lax.broadcasted_iota(jnp.int32, qkv.shape, 1)
    swapped = jnp.where((lane & 1) == 0,
                        pltpu.roll(qkv, W - 1, axis=1),       # even lane i <- element i+1
                        pltpu.roll(qkv, 1, axis=1))           # odd  lane i <- element i-1
    qkv = qkv * cos_ref[...] + swapped * sin_ref[...]

    # ---- per-head causal attention (GQA: kv head = h // N_REP), folded wo projection ----
    row = jax.lax.broadcasted_iota(jnp.int32, (S, S), 0)
    col = jax.lax.broadcasted_iota(jnp.int32, (S, S), 1)
    causal = col <= row
    scale = 1.0 / math.sqrt(HEAD_DIM)

    acc = x                                                   # residual + sum_h (o_h @ wo_h)
    for h in range(N_HEADS):                                  # unrolled at trace time
        kvh = h // N_REP
        qh = qkv[:, h * HEAD_DIM:(h + 1) * HEAD_DIM]
        kh = qkv[:, DQ + kvh * HEAD_DIM: DQ + (kvh + 1) * HEAD_DIM]
        vh = qkv[:, DQ + DKV + kvh * HEAD_DIM: DQ + DKV + (kvh + 1) * HEAD_DIM]
        s = jax.lax.dot_general(qh, kh, (((1,), (1,)), ((), ())),
                                preferred_element_type=jnp.float32) * scale
        s = jnp.where(causal, s, -jnp.inf)                    # causal mask (triu(-inf, 1))
        m = jnp.max(s, axis=-1, keepdims=True)
        p = jnp.exp(s - m)
        p = p * pl.reciprocal(jnp.sum(p, axis=-1, keepdims=True), approx=True)
        oh = jnp.dot(p, vh, preferred_element_type=jnp.float32)
        # concat(heads) @ wo  ==  sum_h  o_h @ wo[h*hd:(h+1)*hd, :]
        acc = acc + jnp.dot(oh, wo_ref[h * HEAD_DIM:(h + 1) * HEAD_DIM, :],
                            preferred_element_type=jnp.float32)

    # ---- residual done (acc = x + attn@wo); RMSNorm (ffn_norm) + SwiGLU + residual ----
    h1 = acc
    hn = (h1 * jax.lax.rsqrt(jnp.mean(h1 * h1, axis=-1, keepdims=True) + EPS)) * fnorm_ref[...]
    g = jnp.dot(hn, w1_ref[...], preferred_element_type=jnp.float32)
    u = jnp.dot(hn, w3_ref[...], preferred_element_type=jnp.float32)
    f = (g * jax.nn.sigmoid(g)) * u                           # silu(w1(x)) * w3(x)
    o_ref[0] = h1 + jnp.dot(f, w2_ref[...], preferred_element_type=jnp.float32)


def minimind_block(x, params, rope_tabs):
    B, S, D = x.shape
    cos_tab, sin_tab = rope_tabs
    # pack q|k|v weights into one lane-dense (D, 128) operand
    wqkv_t = jnp.concatenate([params['wq_t'], params['wk_t'], params['wv_t']], axis=1)

    def full(a):
        return pl.BlockSpec(a.shape, lambda b, _nd=a.ndim: (0,) * _nd)

    out = pl.pallas_call(
        _block_kernel,
        grid=(B,),
        in_specs=[pl.BlockSpec((1, S, D), lambda b: (b, 0, 0)),
                  full(params['attn_norm']), full(params['ffn_norm']),
                  full(wqkv_t), full(params['wo_t']),
                  full(params['w1_t']), full(params['w3_t']), full(params['w2_t']),
                  full(cos_tab), full(sin_tab)],
        out_specs=pl.BlockSpec((1, S, D), lambda b: (b, 0, 0)),
        out_shape=jax.ShapeDtypeStruct((B, S, D), jnp.float32),
        compiler_params=pltpu.CompilerParams(
            dimension_semantics=("parallel",)),   # both v7x TCs get one batch each
    )(x, params['attn_norm'], params['ffn_norm'], wqkv_t, params['wo_t'],
      params['w1_t'], params['w3_t'], params['w2_t'], cos_tab, sin_tab)
    # past_kv would be (k, v) when use_cache=True; not exercised here.
    return out


# ---------------------------------------------------------------------------
# Pure-JAX reference (mirrors the PyTorch forward exactly)
# ---------------------------------------------------------------------------
def reference_block(x, p, cos, sin):
    def rms(v, w):
        return w * (v * jax.lax.rsqrt(jnp.mean(v * v, axis=-1, keepdims=True) + EPS))

    B, S, D = x.shape
    xn = rms(x, p['attn_norm'])
    q = (xn @ p['wq_t']).reshape(B, S, N_HEADS, HEAD_DIM)
    k = (xn @ p['wk_t']).reshape(B, S, N_KV_HEADS, HEAD_DIM)
    v = (xn @ p['wv_t']).reshape(B, S, N_KV_HEADS, HEAD_DIM)

    def rope(t):
        tr = t.reshape(*t.shape[:-1], HEAD_DIM // 2, 2)
        re, im = tr[..., 0], tr[..., 1]
        c = cos[None, :, None, :]
        s_ = sin[None, :, None, :]
        return jnp.stack([re * c - im * s_, re * s_ + im * c], axis=-1).reshape(t.shape)

    q, k = rope(q), rope(k)
    k = jnp.repeat(k, N_REP, axis=2)
    v = jnp.repeat(v, N_REP, axis=2)
    q, k, v = (t.transpose(0, 2, 1, 3) for t in (q, k, v))
    s = jnp.einsum('bhqd,bhkd->bhqk', q, k) / math.sqrt(HEAD_DIM)
    mask = jnp.triu(jnp.full((S, S), -jnp.inf, dtype=jnp.float32), k=1)
    a = jax.nn.softmax(s + mask, axis=-1)
    o = jnp.einsum('bhqk,bhkd->bhqd', a, v).transpose(0, 2, 1, 3).reshape(B, S, D)
    h = x + o @ p['wo_t']
    hn = rms(h, p['ffn_norm'])
    return h + (jax.nn.silu(hn @ p['w1_t']) * (hn @ p['w3_t'])) @ p['w2_t']


# ---------------------------------------------------------------------------
# Deterministic parameter / rope-table construction
# ---------------------------------------------------------------------------
def make_params(key):
    ks = jax.random.split(key, 6)
    scale = 0.05
    return {
        'attn_norm': jnp.ones((1, DIM), jnp.float32),
        'ffn_norm': jnp.ones((1, DIM), jnp.float32),
        'wq_t': scale * jax.random.normal(ks[0], (DIM, DQ), jnp.float32),
        'wk_t': scale * jax.random.normal(ks[1], (DIM, DKV), jnp.float32),
        'wv_t': scale * jax.random.normal(ks[2], (DIM, DKV), jnp.float32),
        'wo_t': scale * jax.random.normal(ks[3], (DQ, DIM), jnp.float32),
        'w1_t': scale * jax.random.normal(ks[4], (DIM, HIDDEN), jnp.float32),
        'w3_t': scale * jax.random.normal(ks[5], (DIM, HIDDEN), jnp.float32),
        'w2_t': scale * jax.random.normal(jax.random.fold_in(key, 7), (HIDDEN, DIM), jnp.float32),
    }


def make_rope(seq):
    freqs = 1.0 / (ROPE_THETA ** (jnp.arange(0, HEAD_DIM, 2, dtype=jnp.float32) / HEAD_DIM))
    t = jnp.arange(seq, dtype=jnp.float32)
    ang = jnp.outer(t, freqs)                              # (S, hd/2) == angle(pos_cis)
    cos, sin = jnp.cos(ang), jnp.sin(ang)
    cos_full = jnp.repeat(cos, 2, axis=-1)                 # [c0,c0,c1,c1,...]
    sin_signed = jnp.stack([-sin, sin], axis=-1).reshape(seq, HEAD_DIM)  # [-s0,s0,-s1,s1,...]
    # packed (S, 128) tables for the q|k|v slab: v region gets cos=1, sin=0 (pass-through)
    cos_tab = jnp.concatenate([jnp.tile(cos_full, (1, N_HEADS)),
                               jnp.tile(cos_full, (1, N_KV_HEADS)),
                               jnp.ones((seq, DKV), jnp.float32)], axis=-1)
    sin_tab = jnp.concatenate([jnp.tile(sin_signed, (1, N_HEADS)),
                               jnp.tile(sin_signed, (1, N_KV_HEADS)),
                               jnp.zeros((seq, DKV), jnp.float32)], axis=-1)
    assert cos_tab.shape == (seq, QKV_W)
    return (cos_tab, sin_tab), cos, sin


if __name__ == "__main__":
    key = jax.random.PRNGKey(0)
    kx, kp = jax.random.split(key)
    x = jax.random.normal(kx, (BATCH, SEQ, DIM), jnp.float32)
    params = make_params(kp)
    rope_tabs, cos, sin = make_rope(SEQ)

    out = minimind_block(x, params, rope_tabs)
    out = jax.block_until_ready(out)

    ref = jax.block_until_ready(reference_block(x, params, cos, sin))
    assert out.shape == (BATCH, SEQ, DIM)
    assert jnp.all(jnp.isfinite(out))
    assert jnp.allclose(out, ref, atol=1e-2, rtol=1e-2), float(jnp.max(jnp.abs(out - ref)))

    print("KERNEL_OK")
</pallas_src>

<mosaic_0001>
module attributes {stable_mosaic.version = 11 : i64} {
  func.func @_block_kernel(%arg0: i32, %arg1: memref<1x8x64xf32, #tpu.memory_space<vmem>>, %arg2: memref<1x64xf32, #tpu.memory_space<vmem>>, %arg3: memref<1x64xf32, #tpu.memory_space<vmem>>, %arg4: memref<64x128xf32, #tpu.memory_space<vmem>>, %arg5: memref<64x64xf32, #tpu.memory_space<vmem>>, %arg6: memref<64x192xf32, #tpu.memory_space<vmem>>, %arg7: memref<64x192xf32, #tpu.memory_space<vmem>>, %arg8: memref<192x64xf32, #tpu.memory_space<vmem>>, %arg9: memref<8x128xf32, #tpu.memory_space<vmem>>, %arg10: memref<8x128xf32, #tpu.memory_space<vmem>>, %arg11: memref<1x8x64xf32, #tpu.memory_space<vmem>>) attributes {dimension_semantics = [#tpu.dimension_semantics<parallel>], iteration_bounds = array<i64: 2>, scalar_prefetch = 0 : i64, scratch_operands = 0 : i64, tpu.core_type = #tpu.core_type<tc>, window_params = [{transform_indices = @transform_0, window_bounds = array<i64: 1, 8, 64>}, {pipeline_mode = #tpu.pipeline_mode<synchronous>, transform_indices = @transform_1, window_bounds = array<i64: 1, 64>}, {pipeline_mode = #tpu.pipeline_mode<synchronous>, transform_indices = @transform_2, window_bounds = array<i64: 1, 64>}, {pipeline_mode = #tpu.pipeline_mode<synchronous>, transform_indices = @transform_3, window_bounds = array<i64: 64, 128>}, {pipeline_mode = #tpu.pipeline_mode<synchronous>, transform_indices = @transform_4, window_bounds = array<i64: 64, 64>}, {pipeline_mode = #tpu.pipeline_mode<synchronous>, transform_indices = @transform_5, window_bounds = array<i64: 64, 192>}, {pipeline_mode = #tpu.pipeline_mode<synchronous>, transform_indices = @transform_6, window_bounds = array<i64: 64, 192>}, {pipeline_mode = #tpu.pipeline_mode<synchronous>, transform_indices = @transform_7, window_bounds = array<i64: 192, 64>}, {pipeline_mode = #tpu.pipeline_mode<synchronous>, transform_indices = @transform_8, window_bounds = array<i64: 8, 128>}, {pipeline_mode = #tpu.pipeline_mode<synchronous>, transform_indices = @transform_9, window_bounds = array<i64: 8, 128>}, {transform_indices = @transform_10, window_bounds = array<i64: 1, 8, 64>}]} {
    %c0 = arith.constant 0 : index
    %c0_0 = arith.constant 0 : index
    %c0_1 = arith.constant 0 : index
    %0 = vector.load %arg1[%c0, %c0_0, %c0_1] : memref<1x8x64xf32, #tpu.memory_space<vmem>>, vector<1x8x64xf32>
    %1 = vector.shape_cast %0 : vector<1x8x64xf32> to vector<8x64xf32>
    %2 = arith.mulf %1, %1 : vector<8x64xf32>
    %cst = arith.constant dense<0.000000e+00> : vector<8xf32>
    %3 = vector.multi_reduction <add>, %2, %cst [1] : vector<8x64xf32> to vector<8xf32>
    %4 = vector.shape_cast %3 : vector<8xf32> to vector<8x1xf32>
    %cst_2 = arith.constant 6.400000e+01 : f32
    %5 = vector.broadcast %cst_2 : f32 to vector<8x1xf32>
    %6 = arith.divf %4, %5 : vector<8x1xf32>
    %cst_3 = arith.constant 9.99999974E-6 : f32
    %7 = vector.broadcast %cst_3 : f32 to vector<8x1xf32>
    %8 = arith.addf %6, %7 : vector<8x1xf32>
    %9 = math.rsqrt %8 : vector<8x1xf32>
    %10 = vector.broadcast %9 : vector<8x1xf32> to vector<8x64xf32>
    %11 = arith.mulf %1, %10 : vector<8x64xf32>
    %c0_4 = arith.constant 0 : index
    %c0_5 = arith.constant 0 : index
    %12 = vector.load %arg2[%c0_4, %c0_5] : memref<1x64xf32, #tpu.memory_space<vmem>>, vector<1x64xf32>
    %13 = vector.broadcast %12 : vector<1x64xf32> to vector<8x64xf32>
    %14 = arith.mulf %11, %13 : vector<8x64xf32>
    %c0_6 = arith.constant 0 : index
    %c0_7 = arith.constant 0 : index
    %15 = vector.load %arg4[%c0_6, %c0_7] : memref<64x128xf32, #tpu.memory_space<vmem>>, vector<64x128xf32>
    %cst_8 = arith.constant dense<0.000000e+00> : vector<8x128xf32>
    %16 = tpu.matmul %14, %15, %cst_8 {dimension_numbers = #tpu.dot_dimension_numbers<[1], [0], [0], [1], [0, 0, 1, 1], [], []>} : vector<8x64xf32>, vector<64x128xf32>, vector<8x128xf32> -> vector<8x128xf32>
    %17 = tpu.iota {dimensions = array<i32: 1>} : vector<8x128xi32>
    %c1_i32 = arith.constant 1 : i32
    %18 = vector.broadcast %c1_i32 : i32 to vector<8x128xi32>
    %19 = arith.andi %17, %18 : vector<8x128xi32>
    %c0_i32 = arith.constant 0 : i32
    %20 = vector.broadcast %c0_i32 : i32 to vector<8x128xi32>
    %21 = arith.cmpi eq, %19, %20 : vector<8x128xi32>
    %c127_i32 = arith.constant 127 : i32
    %22 = tpu.dynamic_rotate %16 by %c127_i32 dim 1 : vector<8x128xf32>, i32 -> vector<8x128xf32>
    %c1_i32_9 = arith.constant 1 : i32
    %23 = tpu.dynamic_rotate %16 by %c1_i32_9 dim 1 : vector<8x128xf32>, i32 -> vector<8x128xf32>
    %24 = arith.select %21, %22, %23 : vector<8x128xi1>, vector<8x128xf32>
    %c0_10 = arith.constant 0 : index
    %c0_11 = arith.constant 0 : index
    %25 = vector.load %arg9[%c0_10, %c0_11] : memref<8x128xf32, #tpu.memory_space<vmem>>, vector<8x128xf32>
    %26 = arith.mulf %16, %25 : vector<8x128xf32>
    %c0_12 = arith.constant 0 : index
    %c0_13 = arith.constant 0 : index
    %27 = vector.load %arg10[%c0_12, %c0_13] : memref<8x128xf32, #tpu.memory_space<vmem>>, vector<8x128xf32>
    %28 = arith.mulf %24, %27 : vector<8x128xf32>
    %29 = arith.addf %26, %28 : vector<8x128xf32>
    %30 = tpu.iota {dimensions = array<i32: 0>} : vector<8x8xi32>
    %31 = tpu.iota {dimensions = array<i32: 1>} : vector<8x8xi32>
    %32 = arith.cmpi sle, %31, %30 : vector<8x8xi32>
    %33 = vector.extract_strided_slice %29 {offsets = [0, 0], sizes = [8, 16], strides = [1, 1]} : vector<8x128xf32> to vector<8x16xf32>
    %34 = vector.extract_strided_slice %29 {offsets = [0, 64], sizes = [8, 16], strides = [1, 1]} : vector<8x128xf32> to vector<8x16xf32>
    %35 = vector.extract_strided_slice %29 {offsets = [0, 96], sizes = [8, 16], strides = [1, 1]} : vector<8x128xf32> to vector<8x16xf32>
    %cst_14 = arith.constant dense<0.000000e+00> : vector<8x8xf32>
    %36 = tpu.matmul %33, %34, %cst_14 {dimension_numbers = #tpu.dot_dimension_numbers<[1], [1], [0], [0], [0, 0, 1, 0], [], []>} : vector<8x16xf32>, vector<8x16xf32>, vector<8x8xf32> -> vector<8x8xf32>
    %cst_15 = arith.constant 2.500000e-01 : f32
    %37 = vector.broadcast %cst_15 : f32 to vector<8x8xf32>
    %38 = arith.mulf %36, %37 : vector<8x8xf32>
    %cst_16 = arith.constant 0xFF800000 : f32
    %39 = vector.broadcast %cst_16 : f32 to vector<8x8xf32>
    %40 = arith.select %32, %38, %39 : vector<8x8xi1>, vector<8x8xf32>
    %cst_17 = arith.constant dense<0xFF800000> : vector<8xf32>
    %41 = vector.multi_reduction <maximumf>, %40, %cst_17 [1] : vector<8x8xf32> to vector<8xf32>
    %42 = vector.shape_cast %41 : vector<8xf32> to vector<8x1xf32>
    %43 = vector.broadcast %42 : vector<8x1xf32> to vector<8x8xf32>
    %44 = arith.subf %40, %43 : vector<8x8xf32>
    %45 = math.exp %44 : vector<8x8xf32>
    %cst_18 = arith.constant dense<0.000000e+00> : vector<8xf32>
    %46 = vector.multi_reduction <add>, %45, %cst_18 [1] : vector<8x8xf32> to vector<8xf32>
    %47 = vector.shape_cast %46 : vector<8xf32> to vector<8x1xf32>
    %48 = tpu.reciprocal %47 {approx = true} : vector<8x1xf32> -> vector<8x1xf32>
    %49 = vector.broadcast %48 : vector<8x1xf32> to vector<8x8xf32>
    %50 = arith.mulf %45, %49 : vector<8x8xf32>
    %cst_19 = arith.constant dense<0.000000e+00> : vector<8x16xf32>
    %51 = tpu.matmul %50, %35, %cst_19 {dimension_numbers = #tpu.dot_dimension_numbers<[1], [0], [0], [1], [0, 0, 1, 1], [], []>} : vector<8x8xf32>, vector<8x16xf32>, vector<8x16xf32> -> vector<8x16xf32>
    %c0_20 = arith.constant 0 : index
    %c0_21 = arith.constant 0 : index
    %52 = vector.load %arg5[%c0_20, %c0_21] : memref<64x64xf32, #tpu.memory_space<vmem>>, vector<16x64xf32>
    %cst_22 = arith.constant dense<0.000000e+00> : vector<8x64xf32>
    %53 = tpu.matmul %51, %52, %cst_22 {dimension_numbers = #tpu.dot_dimension_numbers<[1], [0], [0], [1], [0, 0, 1, 1], [], []>} : vector<8x16xf32>, vector<16x64xf32>, vector<8x64xf32> -> vector<8x64xf32>
    %54 = arith.addf %1, %53 : vector<8x64xf32>
    %55 = vector.extract_strided_slice %29 {offsets = [0, 16], sizes = [8, 16], strides = [1, 1]} : vector<8x128xf32> to vector<8x16xf32>
    %56 = vector.extract_strided_slice %29 {offsets = [0, 64], sizes = [8, 16], strides = [1, 1]} : vector<8x128xf32> to vector<8x16xf32>
    %57 = vector.extract_strided_slice %29 {offsets = [0, 96], sizes = [8, 16], strides = [1, 1]} : vector<8x128xf32> to vector<8x16xf32>
    %cst_23 = arith.constant dense<0.000000e+00> : vector<8x8xf32>
    %58 = tpu.matmul %55, %56, %cst_23 {dimension_numbers = #tpu.dot_dimension_numbers<[1], [1], [0], [0], [0, 0, 1, 0], [], []>} : vector<8x16xf32>, vector<8x16xf32>, vector<8x8xf32> -> vector<8x8xf32>
    %cst_24 = arith.constant 2.500000e-01 : f32
    %59 = vector.broadcast %cst_24 : f32 to vector<8x8xf32>
    %60 = arith.mulf %58, %59 : vector<8x8xf32>
    %cst_25 = arith.constant 0xFF800000 : f32
    %61 = vector.broadcast %cst_25 : f32 to vector<8x8xf32>
    %62 = arith.select %32, %60, %61 : vector<8x8xi1>, vector<8x8xf32>
    %cst_26 = arith.constant dense<0xFF800000> : vector<8xf32>
    %63 = vector.multi_reduction <maximumf>, %62, %cst_26 [1] : vector<8x8xf32> to vector<8xf32>
    %64 = vector.shape_cast %63 : vector<8xf32> to vector<8x1xf32>
    %65 = vector.broadcast %64 : vector<8x1xf32> to vector<8x8xf32>
    %66 = arith.subf %62, %65 : vector<8x8xf32>
    %67 = math.exp %66 : vector<8x8xf32>
    %cst_27 = arith.constant dense<0.000000e+00> : vector<8xf32>
    %68 = vector.multi_reduction <add>, %67, %cst_27 [1] : vector<8x8xf32> to vector<8xf32>
    %69 = vector.shape_cast %68 : vector<8xf32> to vector<8x1xf32>
    %70 = tpu.reciprocal %69 {approx = true} : vector<8x1xf32> -> vector<8x1xf32>
    %71 = vector.broadcast %70 : vector<8x1xf32> to vector<8x8xf32>
    %72 = arith.mulf %67, %71 : vector<8x8xf32>
    %cst_28 = arith.constant dense<0.000000e+00> : vector<8x16xf32>
    %73 = tpu.matmul %72, %57, %cst_28 {dimension_numbers = #tpu.dot_dimension_numbers<[1], [0], [0], [1], [0, 0, 1, 1], [], []>} : vector<8x8xf32>, vector<8x16xf32>, vector<8x16xf32> -> vector<8x16xf32>
    %c16 = arith.constant 16 : index
    %c0_29 = arith.constant 0 : index
    %74 = vector.load %arg5[%c16, %c0_29] : memref<64x64xf32, #tpu.memory_space<vmem>>, vector<16x64xf32>
    %cst_30 = arith.constant dense<0.000000e+00> : vector<8x64xf32>
    %75 = tpu.matmul %73, %74, %cst_30 {dimension_numbers = #tpu.dot_dimension_numbers<[1], [0], [0], [1], [0, 0, 1, 1], [], []>} : vector<8x16xf32>, vector<16x64xf32>, vector<8x64xf32> -> vector<8x64xf32>
    %76 = arith.addf %54, %75 : vector<8x64xf32>
    %77 = vector.extract_strided_slice %29 {offsets = [0, 32], sizes = [8, 16], strides = [1, 1]} : vector<8x128xf32> to vector<8x16xf32>
    %78 = vector.extract_strided_slice %29 {offsets = [0, 80], sizes = [8, 16], strides = [1, 1]} : vector<8x128xf32> to vector<8x16xf32>
    %79 = vector.extract_strided_slice %29 {offsets = [0, 112], sizes = [8, 16], strides = [1, 1]} : vector<8x128xf32> to vector<8x16xf32>
    %cst_31 = arith.constant dense<0.000000e+00> : vector<8x8xf32>
    %80 = tpu.matmul %77, %78, %cst_31 {dimension_numbers = #tpu.dot_dimension_numbers<[1], [1], [0], [0], [0, 0, 1, 0], [], []>} : vector<8x16xf32>, vector<8x16xf32>, vector<8x8xf32> -> vector<8x8xf32>
    %cst_32 = arith.constant 2.500000e-01 : f32
    %81 = vector.broadcast %cst_32 : f32 to vector<8x8xf32>
    %82 = arith.mulf %80, %81 : vector<8x8xf32>
    %cst_33 = arith.constant 0xFF800000 : f32
    %83 = vector.broadcast %cst_33 : f32 to vector<8x8xf32>
    %84 = arith.select %32, %82, %83 : vector<8x8xi1>, vector<8x8xf32>
    %cst_34 = arith.constant dense<0xFF800000> : vector<8xf32>
    %85 = vector.multi_reduction <maximumf>, %84, %cst_34 [1] : vector<8x8xf32> to vector<8xf32>
    %86 = vector.shape_cast %85 : vector<8xf32> to vector<8x1xf32>
    %87 = vector.broadcast %86 : vector<8x1xf32> to vector<8x8xf32>
    %88 = arith.subf %84, %87 : vector<8x8xf32>
    %89 = math.exp %88 : vector<8x8xf32>
    %cst_35 = arith.constant dense<0.000000e+00> : vector<8xf32>
    %90 = vector.multi_reduction <add>, %89, %cst_35 [1] : vector<8x8xf32> to vector<8xf32>
    %91 = vector.shape_cast %90 : vector<8xf32> to vector<8x1xf32>
    %92 = tpu.reciprocal %91 {approx = true} : vector<8x1xf32> -> vector<8x1xf32>
    %93 = vector.broadcast %92 : vector<8x1xf32> to vector<8x8xf32>
    %94 = arith.mulf %89, %93 : vector<8x8xf32>
    %cst_36 = arith.constant dense<0.000000e+00> : vector<8x16xf32>
    %95 = tpu.matmul %94, %79, %cst_36 {dimension_numbers = #tpu.dot_dimension_numbers<[1], [0], [0], [1], [0, 0, 1, 1], [], []>} : vector<8x8xf32>, vector<8x16xf32>, vector<8x16xf32> -> vector<8x16xf32>
    %c32 = arith.constant 32 : index
    %c0_37 = arith.constant 0 : index
    %96 = vector.load %arg5[%c32, %c0_37] : memref<64x64xf32, #tpu.memory_space<vmem>>, vector<16x64xf32>
    %cst_38 = arith.constant dense<0.000000e+00> : vector<8x64xf32>
    %97 = tpu.matmul %95, %96, %cst_38 {dimension_numbers = #tpu.dot_dimension_numbers<[1], [0], [0], [1], [0, 0, 1, 1], [], []>} : vector<8x16xf32>, vector<16x64xf32>, vector<8x64xf32> -> vector<8x64xf32>
    %98 = arith.addf %76, %97 : vector<8x64xf32>
    %99 = vector.extract_strided_slice %29 {offsets = [0, 48], sizes = [8, 16], strides = [1, 1]} : vector<8x128xf32> to vector<8x16xf32>
    %100 = vector.extract_strided_slice %29 {offsets = [0, 80], sizes = [8, 16], strides = [1, 1]} : vector<8x128xf32> to vector<8x16xf32>
    %101 = vector.extract_strided_slice %29 {offsets = [0, 112], sizes = [8, 16], strides = [1, 1]} : vector<8x128xf32> to vector<8x16xf32>
    %cst_39 = arith.constant dense<0.000000e+00> : vector<8x8xf32>
    %102 = tpu.matmul %99, %100, %cst_39 {dimension_numbers = #tpu.dot_dimension_numbers<[1], [1], [0], [0], [0, 0, 1, 0], [], []>} : vector<8x16xf32>, vector<8x16xf32>, vector<8x8xf32> -> vector<8x8xf32>
    %cst_40 = arith.constant 2.500000e-01 : f32
    %103 = vector.broadcast %cst_40 : f32 to vector<8x8xf32>
    %104 = arith.mulf %102, %103 : vector<8x8xf32>
    %cst_41 = arith.constant 0xFF800000 : f32
    %105 = vector.broadcast %cst_41 : f32 to vector<8x8xf32>
    %106 = arith.select %32, %104, %105 : vector<8x8xi1>, vector<8x8xf32>
    %cst_42 = arith.constant dense<0xFF800000> : vector<8xf32>
    %107 = vector.multi_reduction <maximumf>, %106, %cst_42 [1] : vector<8x8xf32> to vector<8xf32>
    %108 = vector.shape_cast %107 : vector<8xf32> to vector<8x1xf32>
    %109 = vector.broadcast %108 : vector<8x1xf32> to vector<8x8xf32>
    %110 = arith.subf %106, %109 : vector<8x8xf32>
    %111 = math.exp %110 : vector<8x8xf32>
    %cst_43 = arith.constant dense<0.000000e+00> : vector<8xf32>
    %112 = vector.multi_reduction <add>, %111, %cst_43 [1] : vector<8x8xf32> to vector<8xf32>
    %113 = vector.shape_cast %112 : vector<8xf32> to vector<8x1xf32>
    %114 = tpu.reciprocal %113 {approx = true} : vector<8x1xf32> -> vector<8x1xf32>
    %115 = vector.broadcast %114 : vector<8x1xf32> to vector<8x8xf32>
    %116 = arith.mulf %111, %115 : vector<8x8xf32>
    %cst_44 = arith.constant dense<0.000000e+00> : vector<8x16xf32>
    %117 = tpu.matmul %116, %101, %cst_44 {dimension_numbers = #tpu.dot_dimension_numbers<[1], [0], [0], [1], [0, 0, 1, 1], [], []>} : vector<8x8xf32>, vector<8x16xf32>, vector<8x16xf32> -> vector<8x16xf32>
    %c48 = arith.constant 48 : index
    %c0_45 = arith.constant 0 : index
    %118 = vector.load %arg5[%c48, %c0_45] : memref<64x64xf32, #tpu.memory_space<vmem>>, vector<16x64xf32>
    %cst_46 = arith.constant dense<0.000000e+00> : vector<8x64xf32>
    %119 = tpu.matmul %117, %118, %cst_46 {dimension_numbers = #tpu.dot_dimension_numbers<[1], [0], [0], [1], [0, 0, 1, 1], [], []>} : vector<8x16xf32>, vector<16x64xf32>, vector<8x64xf32> -> vector<8x64xf32>
    %120 = arith.addf %98, %119 : vector<8x64xf32>
    %121 = arith.mulf %120, %120 : vector<8x64xf32>
    %cst_47 = arith.constant dense<0.000000e+00> : vector<8xf32>
    %122 = vector.multi_reduction <add>, %121, %cst_47 [1] : vector<8x64xf32> to vector<8xf32>
    %123 = vector.shape_cast %122 : vector<8xf32> to vector<8x1xf32>
    %cst_48 = arith.constant 6.400000e+01 : f32
    %124 = vector.broadcast %cst_48 : f32 to vector<8x1xf32>
    %125 = arith.divf %123, %124 : vector<8x1xf32>
    %cst_49 = arith.constant 9.99999974E-6 : f32
    %126 = vector.broadcast %cst_49 : f32 to vector<8x1xf32>
    %127 = arith.addf %125, %126 : vector<8x1xf32>
    %128 = math.rsqrt %127 : vector<8x1xf32>
    %129 = vector.broadcast %128 : vector<8x1xf32> to vector<8x64xf32>
    %130 = arith.mulf %120, %129 : vector<8x64xf32>
    %c0_50 = arith.constant 0 : index
    %c0_51 = arith.constant 0 : index
    %131 = vector.load %arg3[%c0_50, %c0_51] : memref<1x64xf32, #tpu.memory_space<vmem>>, vector<1x64xf32>
    %132 = vector.broadcast %131 : vector<1x64xf32> to vector<8x64xf32>
    %133 = arith.mulf %130, %132 : vector<8x64xf32>
    %c0_52 = arith.constant 0 : index
    %c0_53 = arith.constant 0 : index
    %134 = vector.load %arg6[%c0_52, %c0_53] : memref<64x192xf32, #tpu.memory_space<vmem>>, vector<64x192xf32>
    %cst_54 = arith.constant dense<0.000000e+00> : vector<8x192xf32>
    %135 = tpu.matmul %133, %134, %cst_54 {dimension_numbers = #tpu.dot_dimension_numbers<[1], [0], [0], [1], [0, 0, 1, 1], [], []>} : vector<8x64xf32>, vector<64x192xf32>, vector<8x192xf32> -> vector<8x192xf32>
    %c0_55 = arith.constant 0 : index
    %c0_56 = arith.constant 0 : index
    %136 = vector.load %arg7[%c0_55, %c0_56] : memref<64x192xf32, #tpu.memory_space<vmem>>, vector<64x192xf32>
    %cst_57 = arith.constant dense<0.000000e+00> : vector<8x192xf32>
    %137 = tpu.matmul %133, %136, %cst_57 {dimension_numbers = #tpu.dot_dimension_numbers<[1], [0], [0], [1], [0, 0, 1, 1], [], []>} : vector<8x64xf32>, vector<64x192xf32>, vector<8x192xf32> -> vector<8x192xf32>
    %138 = arith.negf %135 : vector<8x192xf32>
    %139 = math.exp %138 : vector<8x192xf32>
    %cst_58 = arith.constant 1.000000e+00 : f32
    %140 = vector.broadcast %cst_58 : f32 to vector<8x192xf32>
    %141 = arith.addf %140, %139 : vector<8x192xf32>
    %142 = arith.divf %140, %141 : vector<8x192xf32>
    %143 = arith.mulf %135, %142 : vector<8x192xf32>
    %144 = arith.mulf %143, %137 : vector<8x192xf32>
    %c0_59 = arith.constant 0 : index
    %c0_60 = arith.constant 0 : index
    %145 = vector.load %arg8[%c0_59, %c0_60] : memref<192x64xf32, #tpu.memory_space<vmem>>, vector<192x64xf32>
    %cst_61 = arith.constant dense<0.000000e+00> : vector<8x64xf32>
    %146 = tpu.matmul %144, %145, %cst_61 {dimension_numbers = #tpu.dot_dimension_numbers<[1], [0], [0], [1], [0, 0, 1, 1], [], []>} : vector<8x192xf32>, vector<192x64xf32>, vector<8x64xf32> -> vector<8x64xf32>
    %147 = arith.addf %120, %146 : vector<8x64xf32>
    %c0_62 = arith.constant 0 : index
    %c0_63 = arith.constant 0 : index
    %c0_64 = arith.constant 0 : index
    %148 = vector.load %arg11[%c0_62, %c0_63, %c0_64] : memref<1x8x64xf32, #tpu.memory_space<vmem>>, vector<1x8x64xf32>
    %149 = vector.shape_cast %148 : vector<1x8x64xf32> to vector<8x64xf32>
    %150 = vector.shape_cast %147 : vector<8x64xf32> to vector<1x8x64xf32>
    tpu.vector_store %arg11[%c0_62, %c0_63, %c0_64], %150 {strides = array<i32>} : memref<1x8x64xf32, #tpu.memory_space<vmem>>, vector<1x8x64xf32>,
    return
  }
  func.func @transform_0(%arg0: i32) -> (i32, i32, i32) {
    %c0_i32 = arith.constant 0 : i32
    %c0_i32_0 = arith.constant 0 : i32
    %c0_i32_1 = arith.constant 0 : i32
    return %arg0, %c0_i32, %c0_i32_0 : i32, i32, i32
  }
  func.func @transform_1(%arg0: i32) -> (i32, i32) {
    %c0_i32 = arith.constant 0 : i32
    %c0_i32_0 = arith.constant 0 : i32
    %c0_i32_1 = arith.constant 0 : i32
    return %c0_i32, %c0_i32_0 : i32, i32
  }
  func.func @transform_2(%arg0: i32) -> (i32, i32) {
    %c0_i32 = arith.constant 0 : i32
    %c0_i32_0 = arith.constant 0 : i32
    %c0_i32_1 = arith.constant 0 : i32
    return %c0_i32, %c0_i32_0 : i32, i32
  }
  func.func @transform_3(%arg0: i32) -> (i32, i32) {
    %c0_i32 = arith.constant 0 : i32
    %c0_i32_0 = arith.constant 0 : i32
    %c0_i32_1 = arith.constant 0 : i32
    return %c0_i32, %c0_i32_0 : i32, i32
  }
  func.func @transform_4(%arg0: i32) -> (i32, i32) {
    %c0_i32 = arith.constant 0 : i32
    %c0_i32_0 = arith.constant 0 : i32
    %c0_i32_1 = arith.constant 0 : i32
    return %c0_i32, %c0_i32_0 : i32, i32
  }
  func.func @transform_5(%arg0: i32) -> (i32, i32) {
    %c0_i32 = arith.constant 0 : i32
    %c0_i32_0 = arith.constant 0 : i32
    %c0_i32_1 = arith.constant 0 : i32
    return %c0_i32, %c0_i32_0 : i32, i32
  }
  func.func @transform_6(%arg0: i32) -> (i32, i32) {
    %c0_i32 = arith.constant 0 : i32
    %c0_i32_0 = arith.constant 0 : i32
    %c0_i32_1 = arith.constant 0 : i32
    return %c0_i32, %c0_i32_0 : i32, i32
  }
  func.func @transform_7(%arg0: i32) -> (i32, i32) {
    %c0_i32 = arith.constant 0 : i32
    %c0_i32_0 = arith.constant 0 : i32
    %c0_i32_1 = arith.constant 0 : i32
    return %c0_i32, %c0_i32_0 : i32, i32
  }
  func.func @transform_8(%arg0: i32) -> (i32, i32) {
    %c0_i32 = arith.constant 0 : i32
    %c0_i32_0 = arith.constant 0 : i32
    %c0_i32_1 = arith.constant 0 : i32
    return %c0_i32, %c0_i32_0 : i32, i32
  }
  func.func @transform_9(%arg0: i32) -> (i32, i32) {
    %c0_i32 = arith.constant 0 : i32
    %c0_i32_0 = arith.constant 0 : i32
    %c0_i32_1 = arith.constant 0 : i32
    return %c0_i32, %c0_i32_0 : i32, i32
  }
  func.func @transform_10(%arg0: i32) -> (i32, i32, i32) {
    %c0_i32 = arith.constant 0 : i32
    %c0_i32_0 = arith.constant 0 : i32
    %c0_i32_1 = arith.constant 0 : i32
    return %arg0, %c0_i32, %c0_i32_0 : i32, i32, i32
  }
}

</mosaic_0001>

<bundles_post_ra>
// kernel: tpu_custom_call.1
= control target key start
LH: loop header
LB: loop body
LE: loop exit
PB: predicated region body
PF: predicated region fallthrough
CT: control target
= control target key end

     0   :  { %15 = vsyncpa [#allocation3], 0  ;;  %s2962_s0 = inlined_call_operand.hbm [shape: f32[2,8,64], index: 0, kind: input, shape index: {}]   ;;  %s2963_s1 = inlined_call_operand.vmem [shape: f32[1,64], index: 1, kind: input, shape index: {}]   ;;  %s2964_s2 = inlined_call_operand.vmem [shape: f32[1,64], index: 2, kind: input, shape index: {}]   ;;  %s2965_s3 = inlined_call_operand.vmem [shape: f32[64,128], index: 3, kind: input, shape index: {}]   ;;  %s2966_s4 = inlined_call_operand.hbm [shape: f32[64,64], index: 4, kind: input, shape index: {}]   ;;  %s2967_s5 = inlined_call_operand.vmem [shape: f32[64,192], index: 5, kind: input, shape index: {}]   ;;  %s2968_s6 = inlined_call_operand.vmem [shape: f32[64,192], index: 6, kind: input, shape index: {}]   ;;  %s2969_s7 = inlined_call_operand.vmem [shape: f32[192,64], index: 7, kind: input, shape index: {}]   ;;  %s2970_s8 = inlined_call_operand.vmem [shape: f32[8,128], index: 8, kind: input, shape index: {}]   ;;  %s2971_s9 = inlined_call_operand.vmem [shape: f32[8,128], index: 9, kind: input, shape index: {}]   ;;  %s2972_s10 = inlined_call_operand.hbm [shape: f32[2,8,64], index: 10, kind: output, shape index: {}]  }
   0x1   :  { %17 = vsyncpa [#allocation3 + $0x1], 0 }
   0x2   :  { %18 = vsyncpa [#allocation6], 0 }
   0x3   :  { %19 = vsyncpa [#allocation4], 0 }
   0x4   :  { %21 = vsyncpa [#allocation4 + $0x1], 0  ;;  %s2430_s13 = smov 0   ;;  %s2432_s14 = smov 0  }
   0x5   :  { %s2434_s15 = smov 0   ;;  %s2436_s16 = smov 0  }
   0x6 LB: > { %2980 = sst [smem:[#allocation11_spill]] %s2344_s13  ;;  %s2451_s17 = sadd.s32 4294967295, %s2356_s16   ;;  %s2356_s16 = sphi %s2436_s16, %s2998_s16   ;;  %s2352_s15 = sphi %s2434_s15, %s3001_s15   ;;  %s2348_s14 = sphi %s2432_s14, %s3000_s14   ;;  %s2344_s13 = sphi %s2430_s13, %s2999_s13  }
   0x7   : > { %s1868_s18 = sadd.s32 4294967294, %s2356_s16   ;;  %p47_p0 = scmp.ne.s32.totalorder %s2348_s14, %s2344_s13 }
   0x8   : > { %p2975_p1 = scmp.eq.s32.totalorder %s2451_s17, 0  ;;  %p266_p3 = scmp.eq.s32.totalorder %s1868_s18, 1 }
   0x9   : > { %p1869_p5 = scmp.ge.s32.totalorder %s2356_s16, 1  ;;  %p273_p7 = scmp.lt.s32.totalorder %s2356_s16, 3 }
   0xa   : > { %p2460_p4 = por %p2975_p1, %p47_p0  ;;  %p2465_p6 = por %p266_p3, %p47_p0 }
   0xb   : > { %p2470_p8 = pnand %p1869_p5, %p273_p7  ;;  %s2358_s22 = smov [#allocation5]  }
   0xc   : > { %s2981_s19 = scalar_select %p2460_p4, 1, 0 }
   0xd   : > { %s2982_s20 = scalar_select %p2465_p6, 1, 0 }
   0xe   : > { %s2984_s21 = scalar_select %p2470_p8, 1, 0 }
   0xf   : > { %2983 = sst [smem:[#allocation12_spill]] %s2982_s20  ;;  %s294_s23 = sshll.u32 %s2358_s22, 4  ;;  %s2474_s23 = int_to_ptr.vmem [resolvable:$true] %s294_s23 }
  0x10   : > { %p2137_p9 = pneg %p2470_p8  ;;  %s2486_s25 = sadd.s32 1, %s2356_s16  }
  0x11   : > { %2986 = sst [smem:[#allocation13_spill]] %s2486_s25  ;;  %s34_s26 = sadd.s32 1, %s2352_s15 }
  0x12   : > { %p2481_p11 = pnand %p2137_p9, %p2975_p1  ;;  %s31_s27 = ssub.s32 %s2356_s16, %s2486_s25 }
  0x13   : > { %s2228_s30 = scalar_lea.hbm %s2966_s4, 1024 }
  0x14   : > { %p2229_p12 = scmp.ne.s32.totalorder %s2966_s4, %s2228_s30  ;;  %p2230_p13 = pneg %p2481_p11 }
  0x15   : > { %p2235_p5 = scmp.lt.u32.totalorder %s2228_s30, %s2966_s4 }
  0x16   : > { %p2231_p0 = pnand %p2230_p13, %p2229_p12 }
  0x18   : > { %p2232_p3 = pneg %p2231_p0 }
  0x1a   : > { %p2237_p7 = pnand %p2235_p5, %p2232_p3 }
  0x1c   : > { %2240 = shalt.err (!%p2237_p7)
}
  0x1d   : > { %s2241_s25 = scalar_lea.vmem %s2474_s23, 1024  ;;  %p2249_p2 = scmp.lt.s32.totalorder %s2474_s23, %s2474_s23 }
  0x1e   : > { %p2242_p9 = scmp.ne.s32.totalorder %s2474_s23, %s2241_s25  ;;  %p2250_p6 = scmp.lt.s32.totalorder %s2241_s25, %s2241_s25 }
  0x20   : > { %p2244_p10 = pnand %p2242_p9, %p2230_p13  ;;  %p2251_p4 = por %p2250_p6, %p2249_p2 }
  0x22   : > { %p2245_p1 = pneg %p2244_p10 }
  0x24   : > { %p2252_p8 = pnand %p2251_p4, %p2245_p1 }
  0x26   : > { %2255 = shalt.err (!%p2252_p8)
}
  0x27   : > { %s2359_s28 = smov 128   ;;  %s2360_s29 = smov 8  }
  0x28   : > { %2140 = dma.hbm_to_vmem [thread:$0]  (!%p2481_p11), %s2966_s4, 1024, %s2474_s23, [#allocation6], %s2359_s28, %s2359_s28, %s2360_s29  }
  0x29   : > { %p32_p2 = scmp.eq.s32.totalorder %s31_s27, 0  ;;  %p41_p1 = scmp.ne.s32.totalorder %s2352_s15, %s2348_s14 }
  0x2a   : > { %p42_p4 = scmp.eq.s32.totalorder %s2356_s16, 0  ;;  %p2150_p6 = scmp.lt.s32.totalorder %s2356_s16, 2 }
  0x2b   : > { %s2517_s25 = scalar_select %p32_p2, %s2352_s15, %s34_s26  }
  0x2c   : > { %p43_p8 = por %p42_p4, %p41_p1  ;;  %p2987_p10 = scmp.eq.s32.totalorder %s2451_s17, 1 }
  0x2d   : > { %s323_s18 = sand.u32 1, %s2352_s15   ;;  %s1873_s22 = sshll.u32 %s2356_s16, 7 }
  0x2e   : > { %p2521_p12 = por %p2987_p10, %p41_p1  ;;  %s1872_s20 = sshll.u32 %s323_s18, 3 }
  0x2f   : > { %s2530_s30 = scalar_lea.hbm %s2962_s0, %s1873_s22  ;;  %s327_s23 = scalar_lea.vmem [#allocation2], %s1872_s20 }
  0x30   : > { %s334_s26 = sshll.u32 %s327_s23, 4  ;;  %p2532_p11 = pnand %p2150_p6, %p43_p8  ;;  %s2536_s26 = int_to_ptr.vmem [resolvable:$true] %s334_s26 }
  0x31   : > { %s324_s28 = scalar_lea.sflag [#allocation3], %s323_s18  ;;  %s2256_s29 = scalar_lea.hbm %s2530_s30, 128 }
  0x32   : > { %p2257_p13 = scmp.ne.s32.totalorder %s2530_s30, %s2256_s29  ;;  %p2258_p0 = pneg %p2532_p11 }
  0x33   : > { %s2261_s11 = scalar_lea.hbm %s2962_s0, 256  ;;  %p2262_p7 = scmp.lt.u32.totalorder %s2530_s30, %s2962_s0 }
  0x34   : > { %p2259_p3 = pnand %p2258_p0, %p2257_p13  ;;  %p2263_p9 = scmp.lt.u32.totalorder %s2261_s11, %s2256_s29 }
  0x35   : > { %p2265_p1 = scmp.lt.u32.totalorder %s2256_s29, %s2530_s30 }
  0x36   : > { %p2260_p5 = pneg %p2259_p3  ;;  %p2264_p2 = por %p2263_p9, %p2262_p7 }
  0x38   : > { %p2266_p4 = por %p2265_p1, %p2264_p2 }
  0x3a   : > { %p2267_p6 = pnand %p2266_p4, %p2260_p5 }
  0x3c   : > { %2270 = shalt.err (!%p2267_p6)
}
  0x3d   : > { %s2271_s18 = scalar_lea.vmem %s2536_s26, 128  ;;  %s2361_s23 = smov [#allocation2]  }
  0x3e   : > { %p2272_p8 = scmp.ne.s32.totalorder %s2536_s26, %s2271_s18  ;;  %s2276_s13 = sshll.u32 %s2361_s23, 4  ;;  %s2277_s13 = int_to_ptr.vmem [resolvable:$false] %s2276_s13 }
  0x3f   : > { %s2278_s20 = scalar_lea.vmem %s2277_s13, 256  ;;  %p2279_p3 = scmp.lt.s32.totalorder %s2536_s26, %s2277_s13 }
  0x40   : > { %p2274_p10 = pnand %p2272_p8, %p2258_p0  ;;  %p2280_p7 = scmp.lt.s32.totalorder %s2278_s20, %s2271_s18 }
  0x42   : > { %p2275_p13 = pneg %p2274_p10  ;;  %p2281_p9 = por %p2280_p7, %p2279_p3 }
  0x44   : > { %p2282_p2 = pnand %p2281_p9, %p2275_p13 }
  0x46   : > { %2285 = shalt.err (!%p2282_p2)
}
  0x47   : > { %2144 = dma.hbm_to_vmem [thread:$0]  (!%p2532_p11), %s2530_s30, 128, %s2536_s26, %s324_s28  }
  0x48   : > { %p2990_p5 = scmp.ne.s32.totalorder %s2984_s21, 0 }
  0x49   : > { %s2566_s29 = sand.u32 (!%p2990_p5), 1, %s2348_s14   ;;  %p2991_p0 = scmp.ne.s32.totalorder (!%p2990_p5), %s2981_s19, 0 }
  0x4a   : > { %343 = sbr.rel (%p2990_p5) target bundleno = 3789 (0xecd), region = 60  ;;  %s1875_s11 = sshll.u32 (!%p2990_p5), %s2566_s29, 3 }
  0x4b   : > { %s346_s22 = scalar_lea.sflag (!%p2990_p5), [#allocation3], %s2566_s29  ;;  %s349_s24 = scalar_lea.vmem (!%p2990_p5), [#allocation2], %s1875_s11 }
  0x51   : > { %2331 = dma.done.wait (%p2991_p0), %s346_s22, 128  }
  0x52   : > { %2333 = vsyncadd (%p2991_p0), %s346_s22, 4294967168  ;;  %p2992_p11 = scmp.eq.s32.totalorder %s2451_s17, 0 }
  0x54   : > { %2335 = dma.done.wait (%p2992_p11), [#allocation6], 1024   ;;  %p2993_p1 = pmov %p2992_p11 }
  0x55   : > { %v2580_v0 = vld [vmem:[%s349_s24] sm:$0xff]  ;;  %vm392_vm0 = vcmask 523264   ;;  %v2362_v6 = vmov 0.0|0.0   ;;  %v411_v7 = vld [vmem:[%s2965_s3 + $0x10] sm:$0xff]  ;;  %v412_v8 = vld [vmem:[%s2965_s3 + $0x18] sm:$0xff]  ;;  %vm2363_vm1 = vmmov 0   ;;  %v490_v26 = vlaneseq }
  0x56   : > { %2337 = vsyncadd (%p2993_p1), [#allocation6], 4294966272  ;;  %v391_v1 = vmul.f32 %v2580_v0, %v2580_v0  ;;  %v409_v3 = vld [vmem:[%s2965_s3] sm:$0xff]  ;;  %v410_v4 = vld [vmem:[%s2965_s3 + $0x8] sm:$0xff]  ;;  %2030 = vmatprep.subr.bf16.mxu1 %v2362_v6  ;;  %v2034_v9 = vpack.c.bf16 %v412_v8, %v411_v7  ;;  %v2364_v12 = vmov 0.0   ;;  %s2365_s18 = smov 1  }
  0x57   : > { %v2031_v5 = vpack.c.bf16 %v410_v4, %v409_v3  ;;  %v413_v10 = vld [vmem:[%s2965_s3 + $0x20] sm:$0xff]  ;;  %v414_v11 = vld [vmem:[%s2965_s3 + $0x28] sm:$0xff]  ;;  %1959 = vmatprep.mubr.msk.f32.mxu1 %vm2363_vm1, %v2364_v12  ;;  %2013 = vmatprep.subr.mxu0 %v2364_v12  ;;  %v415_v14 = vld [vmem:[%s2965_s3 + $0x30] sm:$0xff]  ;;  %s2366_s23 = smov 127   ;;  %v2626_v27 = vand.u32 127, %v490_v26  ;;  %s2367_s21 = smov 64  }
  0x58   : > { %v393_v2 = vsel %vm392_vm0, %v391_v1, 0.0  ;;  %2015 = vmatprep.mubr.msk.f32.mxu0 %vm2363_vm1, %v2364_v12  ;;  %v2037_v13 = vpack.c.bf16 %v414_v11, %v413_v10  ;;  %v416_v15 = vld [vmem:[%s2965_s3 + $0x38] sm:$0xff]  ;;  %v1878_v21 = vld [vmem:[%s2963_s1] ss:$0 sm:$0xff]  ;;  %vm510_vm3 = vcmask 130048   ;;  %v2644_v38 = vshrl.u32 %v490_v26, 7 }
  0x59   : > { %394 = vadd.xlane.f32.xlu0 %v393_v2  ;;  %2032 = vmatpush3.bf16.msra.mxu1 %v2031_v5  ;;  %v2040_v16 = vpack.c.bf16 %v416_v15, %v415_v14  ;;  %v492_v28 = vand.u32 1, %v2626_v27  ;;  %v499_v29 = vld [vmem:[%s2970_s8] sm:$0xff]  ;;  %vm587_vm5 = vcmask 64512   ;;  %s2368_s30 = smov 32   ;;  %s2369_s19 = smov 112   ;;  %v675_v51 = vld [vmem:[#allocation5] sm:$0xff] }
  0x5a   : > { %2033 = vmatprep.subr.bf16.mxu1 %v2362_v6  ;;  %v501_v30 = vld [vmem:[%s2971_s9] sm:$0xff]  ;;  %vm506_vm4 = vcmp.le.s32.totalorder %v2626_v27, %v2644_v38  ;;  %v676_v52 = vld [vmem:[#allocation5 + $0x8] sm:$0xff]  ;;  %s2370_s26 = smov 48   ;;  %s2371_s27 = smov 80  }
  0x5b   : > { %vm493_vm2 = vcmp.eq.s32.totalorder %v492_v28, 0  ;;  %v2043_v54 = vpack.c.bf16 %v676_v52, %v675_v51  ;;  %s2372_s28 = smov 96   ;;  %v1390_v51 = vld [vmem:[#allocation5 + $0x30] sm:$0xff]  ;;  %v1391_v52 = vld [vmem:[#allocation5 + $0x38] sm:$0xff] }
  0x5d   : > { %2035 = vmatpush3.bf16.msra.mxu1 %v2034_v9 }
  0x5e   : > { %2036 = vmatprep.subr.bf16.mxu1 %v2362_v6 }
  0x61   : > { %2038 = vmatpush3.bf16.msra.mxu1 %v2037_v13 }
  0x62   : > { %2039 = vmatprep.subr.bf16.mxu1 %v2362_v6 }
  0x65   : > { %2041 = vmatpush3.bf16.msra.mxu1 %v2040_v16 }
  0x66   : > { %1962 = vmatprep.subr.mxu1 %v2364_v12 }
  0xe6   : > { %v395_v17 = vpop.xlane.xlu0 %394 }
  0xe7   : > { %v397_v18 = vmul.f32 0.015625, %v395_v17 }
  0xe9   : > { %v398_v19 = vadd.f32 1e-05, %v397_v18  ;;  %v911_v18 = vld [vmem:[#allocation5 + $0x10] sm:$0xff] }
  0xeb   : > { %2200 = vrsqrt.f32 %v398_v19  ;;  %v912_v19 = vld [vmem:[#allocation5 + $0x18] sm:$0xff] }
  0xf5   : > { %v2201_v20 = vpop.eup %2200 }
  0xf6   : > { %v400_v22 = vmul.f32 %v2201_v20, %v2580_v0  ;;  %v2046_v20 = vpack.c.bf16 %v912_v19, %v911_v18  ;;  %v1576_v19 = vld [vmem:[%s2968_s6 + $0x20] sm:$0xff] }
  0xf8   : > { %v408_v23 = vmul.f32 %v1878_v21, %v400_v22 }
  0xfa   : > { %1960 = vmatmul.mubr.msk.f32.vlgmr.msra.gmra.mrb[0].mxu1 %vm392_vm0, %v408_v23 }
  0xfb   : > { %1964 = vmatprep.mubr.msk.f32.mxu1 %vm2363_vm1, %v2364_v12 }
 0x1cd   : > { %v486_v24 = vpop.f32.mrb[0].mxu1 }
 0x1ce   : > { %496 = vrot.lane.b32.xlu1 %v486_v24, %s2365_s18  ;;  %494 = vrot.lane.b32.xlu0 %v486_v24, %s2366_s23  ;;  %v1961_v25 = vpop.f32.mrb[1].mxu1  ;;  %v500_v34 = vmul.f32 %v499_v29, %v486_v24  ;;  %s2373_s18 = smov 16  }
 0x240   : > { %v497_v31 = vpop.permute.xlu1 %496  ;;  %v495_v32 = vpop.permute.xlu0 %494 }
 0x241   : > { %v498_v33 = vsel %vm493_vm2, %v495_v32, %v497_v31 }
 0x242   : > { %v502_v35 = vmul.f32 %v501_v30, %v498_v33 }
 0x244   : > { %v2635_v36 = vadd.f32 %v502_v35, %v500_v34 }
 0x246   : > { %508 = vrot.lane.b32.xlu1 %v2635_v36, %s2367_s21 }
 0x2b8   : > { %v509_v37 = vpop.permute.xlu1 %508 }
 0x2b9   : > { %1963 = vmatpush3.xpose.msk.msra.mxu1 %vm510_vm3, %v509_v37 }
 0x2ba   : > { %1967 = vmatprep.subr.mxu1 %v2364_v12 }
 0x2bc   : > { %1965 = vmatmul.mubr.msk.f32.vlgmr.msra.gmra.mrb[2].mxu1 %vm510_vm3, %v2635_v36 }
 0x2bd   : > { %1969 = vmatprep.mubr.msk.f32.mxu1 %vm2363_vm1, %v2364_v12 }
 0x38f   : > { %v581_v39 = vpop.f32.mrb[2].mxu1 }
 0x390   : > { %v585_v40 = vmul.f32 0.25, %v581_v39  ;;  %v1966_v41 = vpop.f32.mrb[3].mxu1 }
 0x392   : > { %v586_v42 = vsel %vm506_vm4, %v585_v40, -inf }
 0x393   : > { %v588_v43 = vsel %vm587_vm5, %v586_v42, -inf }
 0x394   : > { %589 = vmax.xlane.f32.xlu1 %v588_v43 }
 0x3a5   : > { %599 = vrot.lane.b32.xlu1 %v2635_v36, %s2368_s30  ;;  %s1903_s30 = sshll.u32 %s2451_s17, 7  ;;  %s1775_s17 = scalar_lea.sflag [#allocation4], %s2566_s29 }
 0x421   : > { %v590_v44 = vpop.xlane.xlu1 %589 }
 0x422   : > { %v591_v45 = vsub.f32 %v586_v42, %v590_v44 }
 0x424   : > { %v592_v46 = vmul.f32 1.442695, %v591_v45 }
 0x425   : > { %v600_v47 = vpop.permute.xlu1 %599 }
 0x426   : > { %2202 = vpow2.f32 %v592_v46  ;;  %1968 = vmatpush3.msra.mxu1 %v600_v47 }
 0x427   : > { %2042 = vmatprep.subr.bf16.mxu1 %v2362_v6 }
 0x430   : > { %v2203_v48 = vpop.eup %2202 }
 0x431   : > { %v594_v49 = vsel %vm587_vm5, %v2203_v48, 0.0 }
 0x432   : > { %595 = vadd.xlane.f32.xlu0 %v594_v49 }
 0x448   : > { %751 = vrot.lane.b32.xlu0 %v2635_v36, %s2369_s19  ;;  %s389_s19 = scalar_lea.vmem [#allocation7], %s1875_s11  ;;  %s2374_s11 = smov [#allocation7]  }
 0x449   : > { %s2290_s13 = sshll.u32 %s2374_s11, 4  ;;  %s2291_s13 = int_to_ptr.vmem [resolvable:$false] %s2290_s13 }
 0x44a   : > { %s2292_s20 = scalar_lea.vmem %s2291_s13, 256 }
 0x4bf   : > { %v596_v50 = vpop.xlane.xlu0 %595 }
 0x4c0   : > { %2204 = vrcp.f32 %v596_v50 }
 0x4c3   : > { %v752_v58 = vpop.permute.xlu0 %751 }
 0x4ca   : > { %v2205_v53 = vpop.eup %2204 }
 0x4cb   : > { %v598_v55 = vmul.f32 %v2205_v53, %v2203_v48  ;;  %v2052_v53 = vpack.c.bf16 %v1391_v52, %v1390_v51  ;;  %v1896_v52 = vld [vmem:[%s2964_s2] ss:$0 sm:$0xff] }
 0x4cd   : > { %1970 = vmatmul.mubr.msk.f32.vlgmr.msra.gmra.mrb[4].mxu1 %vm587_vm5, %v598_v55 }
 0x4ce   : > { %2044 = vmatpush3.bf16.msra.mxu1 %v2043_v54  ;;  %1976 = vmatprep.mubr.msk.f32.mxu1 %vm2363_vm1, %v2364_v12 }
 0x4cf   : > { %1979 = vmatprep.subr.mxu1 %v2364_v12 }
 0x5a0   : > { %v671_v56 = vpop.f32.mrb[4].mxu1 }
 0x5a1   : > { %v1971_v57 = vpop.f32.mrb[5].mxu1  ;;  %1977 = vmatmul.mubr.msk.f32.vlgmr.msra.gmra.mrb[6].mxu1 %vm510_vm3, %v671_v56 }
 0x5a2   : > { %1980 = vmatpush3.xpose.msk.msra.mxu1 %vm510_vm3, %v509_v37  ;;  %1981 = vmatprep.mubr.msk.f32.mxu1 %vm2363_vm1, %v2364_v12 }
 0x5a3   : > { %1984 = vmatprep.subr.mxu1 %v2364_v12 }
 0x5a5   : > { %1982 = vmatmul.mubr.msk.f32.vlgmr.msra.gmra.mrb[8].mxu1 %vm510_vm3, %v752_v58 }
 0x5a6   : > { %1985 = vmatpush3.msra.mxu1 %v600_v47  ;;  %1986 = vmatprep.mubr.msk.f32.mxu1 %vm2363_vm1, %v2364_v12  ;;  %v1155_v47 = vld [vmem:[#allocation5 + $0x28] sm:$0xff] }
 0x5a7   : > { %2045 = vmatprep.subr.bf16.mxu1 %v2362_v6 }
 0x678   : > { %v821_v59 = vpop.f32.mrb[8].mxu1 }
 0x679   : > { %v825_v60 = vmul.f32 0.25, %v821_v59  ;;  %v1983_v61 = vpop.f32.mrb[9].mxu1 }
 0x67a   : > { %v1483_v61 = vld [vmem:[%s2967_s5 + $0x8] sm:$0xff] }
 0x67b   : > { %v826_v62 = vsel %vm506_vm4, %v825_v60, -inf }
 0x67c   : > { %v827_v63 = vsel %vm587_vm5, %v826_v62, -inf }
 0x67d   : > { %828 = vmax.xlane.f32.xlu1 %v827_v63  ;;  %v1575_v63 = vld [vmem:[%s2968_s6 + $0x18] sm:$0xff] }
 0x68e   : > { %989 = vrot.lane.b32.xlu1 %v2635_v36, %s2370_s26  ;;  %s1788_s26 = sshll.u32 %s389_s19, 4  ;;  %s2919_s26 = int_to_ptr.vmem [resolvable:$true] %s1788_s26 }
 0x68f   : > { %s2286_s23 = scalar_lea.vmem %s2919_s26, 128  ;;  %p2293_p10 = scmp.lt.s32.totalorder %s2919_s26, %s2291_s13 }
 0x690   : > { %p2287_p4 = scmp.ne.s32.totalorder %s2919_s26, %s2286_s23  ;;  %p2294_p13 = scmp.lt.s32.totalorder %s2292_s20, %s2286_s23 }
 0x692   : > { %1230 = vrot.lane.b32.xlu1 %v2635_v36, %s2371_s27  ;;  %p2288_p6 = pnand %p2287_p4, %p2521_p12  ;;  %p2295_p3 = por %p2294_p13, %p2293_p10 }
 0x694   : > { %p2289_p8 = pneg %p2288_p6 }
 0x696   : > { %p2296_p7 = pnand %p2295_p3, %p2289_p8 }
 0x70a   : > { %v829_v1 = vpop.xlane.xlu1 %828 }
 0x70b   : > { %v830_v2 = vsub.f32 %v826_v62, %v829_v1  ;;  %v1485_v62 = vld [vmem:[%s2967_s5 + $0x18] sm:$0xff]  ;;  %v1482_v1 = vld [vmem:[%s2967_s5] sm:$0xff] }
 0x70d   : > { %v831_v3 = vmul.f32 1.442695, %v830_v2  ;;  %v1484_v2 = vld [vmem:[%s2967_s5 + $0x10] sm:$0xff] }
 0x70e   : > { %v990_v4 = vpop.permute.xlu1 %989 }
 0x70f   : > { %2206 = vpow2.f32 %v831_v3  ;;  %2014 = vmatpush3.xpose.msk.msra.mxu0 %vm510_vm3, %v990_v4 }
 0x710   : > { %2018 = vmatprep.subr.mxu0 %v2364_v12 }
 0x712   : > { %v1231_v5 = vpop.permute.xlu1 %1230 }
 0x713   : > { %2016 = vmatmul.mubr.msk.f32.vlgmr.msra.gmra.mrb[0].mxu0 %vm510_vm3, %v1231_v5  ;;  %v1572_v5 = vld [vmem:[%s2968_s6] sm:$0xff] }
 0x714   : > { %2020 = vmatprep.mubr.msk.f32.mxu0 %vm2363_vm1, %v2364_v12 }
 0x719   : > { %v2207_v7 = vpop.eup %2206 }
 0x71a   : > { %v833_v8 = vsel %vm587_vm5, %v2207_v7, 0.0 }
 0x71b   : > { %834 = vadd.xlane.f32.xlu0 %v833_v8 }
 0x731   : > { %987 = vrot.lane.b32.xlu0 %v2635_v36, %s2372_s28 }
 0x7a8   : > { %v835_v9 = vpop.xlane.xlu0 %834 }
 0x7a9   : > { %2208 = vrcp.f32 %v835_v9  ;;  %v1487_v9 = vld [vmem:[%s2967_s5 + $0x28] sm:$0xff] }
 0x7ac   : > { %v988_v23 = vpop.permute.xlu0 %987 }
 0x7b3   : > { %v2209_v10 = vpop.eup %2208 }
 0x7b4   : > { %v837_v11 = vmul.f32 %v2209_v10, %v2207_v7  ;;  %v1574_v7 = vld [vmem:[%s2968_s6 + $0x10] sm:$0xff]  ;;  %v1489_v10 = vld [vmem:[%s2967_s5 + $0x38] sm:$0xff] }
 0x7b5   : > { %v2072_v8 = vpack.c.bf16 %v1574_v7, %v1572_v5  ;;  %v1686_v5 = vld [vmem:[%s2969_s7 + $0x58] sm:$0xff] }
 0x7b6   : > { %1987 = vmatmul.mubr.msk.f32.vlgmr.msra.gmra.mrb[10].mxu1 %vm587_vm5, %v837_v11  ;;  %v1577_v11 = vld [vmem:[%s2968_s6 + $0x28] sm:$0xff] }
 0x7b7   : > { %1993 = vmatprep.mubr.msk.f32.mxu1 %vm2363_vm1, %v2364_v12  ;;  %2047 = vmatpush3.bf16.msra.mxu1 %v2046_v20  ;;  %v1578_v20 = vld [vmem:[%s2968_s6 + $0x30] sm:$0xff] }
 0x7b8   : > { %1996 = vmatprep.subr.mxu1 %v2364_v12 }
 0x7e6   : > { %v1300_v13 = vpop.f32.mrb[0].mxu0 }
 0x7e7   : > { %v1304_v14 = vmul.f32 0.25, %v1300_v13  ;;  %v2017_v15 = vpop.f32.mrb[1].mxu0  ;;  %v2058_v13 = vpack.c.bf16 %v1489_v10, %v1487_v9  ;;  %v1688_v9 = vld [vmem:[%s2969_s7 + $0x68] sm:$0xff] }
 0x7e8   : > { %v1486_v15 = vld [vmem:[%s2967_s5 + $0x20] sm:$0xff] }
 0x7e9   : > { %v1305_v16 = vsel %vm506_vm4, %v1304_v14, -inf  ;;  %v1579_v14 = vld [vmem:[%s2968_s6 + $0x38] sm:$0xff] }
 0x7ea   : > { %v1306_v17 = vsel %vm587_vm5, %v1305_v16, -inf }
 0x7eb   : > { %1307 = vmax.xlane.f32.xlu0 %v1306_v17  ;;  %v2074_v17 = vpack.c.bf16 %v1579_v14, %v1577_v11  ;;  %v1689_v11 = vld [vmem:[%s2969_s7 + $0x70] sm:$0xff] }
 0x878   : > { %v1308_v24 = vpop.xlane.xlu0 %1307 }
 0x879   : > { %v1309_v25 = vsub.f32 %v1305_v16, %v1308_v24  ;;  %v1488_v16 = vld [vmem:[%s2967_s5 + $0x30] sm:$0xff]  ;;  %v1581_v24 = vld [vmem:[%s2968_s6 + $0x48] sm:$0xff] }
 0x87a   : > { %v2060_v18 = vpack.c.bf16 %v1488_v16, %v1486_v15  ;;  %v1691_v15 = vld [vmem:[%s2969_s7 + $0x80] sm:$0xff]  ;;  %v1692_v16 = vld [vmem:[%s2969_s7 + $0x88] sm:$0xff] }
 0x87b   : > { %v1310_v26 = vmul.f32 1.442695, %v1309_v25 }
 0x87d   : > { %2210 = vpow2.f32 %v1310_v26  ;;  %v1583_v26 = vld [vmem:[%s2968_s6 + $0x58] sm:$0xff] }
 0x887   : > { %v2211_v33 = vpop.eup %2210 }
 0x888   : > { %v1312_v34 = vsel %vm587_vm5, %v2211_v33, 0.0 }
 0x889   : > { %v907_v21 = vpop.f32.mrb[10].mxu1 }
 0x88a   : > { %v1988_v22 = vpop.f32.mrb[11].mxu1  ;;  %1994 = vmatmul.mubr.msk.f32.vlgmr.msra.gmra.mrb[6].mxu1 %vm510_vm3, %v907_v21  ;;  %v2076_v21 = vpack.c.bf16 %v1578_v20, %v1576_v19  ;;  %v1694_v19 = vld [vmem:[%s2969_s7 + $0x98] sm:$0xff] }
 0x88b   : > { %1997 = vmatpush3.xpose.msk.msra.mxu1 %vm510_vm3, %v990_v4  ;;  %1998 = vmatprep.mubr.msk.f32.mxu1 %vm2363_vm1, %v2364_v12  ;;  %v2056_v4 = vpack.c.bf16 %v1484_v2, %v1482_v1  ;;  %v1491_v22 = vld [vmem:[%s2967_s5 + $0x48] sm:$0xff]  ;;  %v1683_v1 = vld [vmem:[%s2969_s7 + $0x40] sm:$0xff] }
 0x88c   : > { %2001 = vmatprep.subr.mxu1 %v2364_v12  ;;  %v1684_v2 = vld [vmem:[%s2969_s7 + $0x48] sm:$0xff] }
 0x88e   : > { %1999 = vmatmul.mubr.msk.f32.vlgmr.msra.gmra.mrb[12].mxu1 %vm510_vm3, %v988_v23  ;;  %v1493_v23 = vld [vmem:[%s2967_s5 + $0x58] sm:$0xff] }
 0x88f   : > { %2003 = vmatprep.mubr.msk.f32.mxu1 %vm2363_vm1, %v2364_v12  ;;  %v2062_v25 = vpack.c.bf16 %v1493_v23, %v1491_v22  ;;  %v1696_v22 = vld [vmem:[%s2969_s7 + $0xa8] sm:$0xff] }
 0x961   : > { %v1061_v28 = vpop.f32.mrb[12].mxu1 }
 0x962   : > { %v1065_v29 = vmul.f32 0.25, %v1061_v28  ;;  %v2000_v30 = vpop.f32.mrb[13].mxu1  ;;  %v1490_v28 = vld [vmem:[%s2967_s5 + $0x40] sm:$0xff] }
 0x963   : > { %v2078_v30 = vpack.c.bf16 %v1583_v26, %v1581_v24  ;;  %v1697_v24 = vld [vmem:[%s2969_s7 + $0xb0] sm:$0xff] }
 0x964   : > { %v1066_v31 = vsel %vm506_vm4, %v1065_v29, -inf  ;;  %v1492_v29 = vld [vmem:[%s2967_s5 + $0x50] sm:$0xff] }
 0x965   : > { %v1067_v32 = vsel %vm587_vm5, %v1066_v31, -inf }
 0x966   : > { %1068 = vmax.xlane.f32.xlu1 %v1067_v32  ;;  %v1580_v32 = vld [vmem:[%s2968_s6 + $0x40] sm:$0xff] }
 0x96a   : > { %1313 = vadd.xlane.f32.xlu1 %v1312_v34 }
 0x9f3   : > { %v1069_v35 = vpop.xlane.xlu1 %1068 }
 0x9f4   : > { %v1070_v37 = vsub.f32 %v1066_v31, %v1069_v35  ;;  %v2064_v31 = vpack.c.bf16 %v1492_v29, %v1490_v28  ;;  %v1495_v35 = vld [vmem:[%s2967_s5 + $0x68] sm:$0xff] }
 0x9f6   : > { %v1071_v39 = vmul.f32 1.442695, %v1070_v37  ;;  %v1497_v37 = vld [vmem:[%s2967_s5 + $0x78] sm:$0xff] }
 0x9f7   : > { %v1314_v27 = vpop.xlane.xlu1 %1313 }
 0x9f8   : > { %2212 = vpow2.f32 %v1071_v39  ;;  %v1585_v39 = vld [vmem:[%s2968_s6 + $0x68] sm:$0xff] }
 0x9f9   : > { %2214 = vrcp.f32 %v1314_v27  ;;  %v1494_v27 = vld [vmem:[%s2967_s5 + $0x60] sm:$0xff] }
 0xa02   : > { %v2213_v40 = vpop.eup %2212 }
 0xa03   : > { %v1073_v41 = vsel %vm587_vm5, %v2213_v40, 0.0  ;;  %v2215_v42 = vpop.eup %2214 }
 0xa04   : > { %1074 = vadd.xlane.f32.xlu1 %v1073_v41  ;;  %v1316_v43 = vmul.f32 %v2215_v42, %v2211_v33  ;;  %v1582_v33 = vld [vmem:[%s2968_s6 + $0x50] sm:$0xff]  ;;  %v1587_v41 = vld [vmem:[%s2968_s6 + $0x78] sm:$0xff] }
 0xa05   : > { %v2080_v34 = vpack.c.bf16 %v1582_v33, %v1580_v32  ;;  %v2082_v42 = vpack.c.bf16 %v1587_v41, %v1585_v39 }
 0xa15   : > { %1078 = vrot.lane.b32.xlu1 %v2635_v36, %s2373_s18  ;;  %v1154_v36 = vld [vmem:[#allocation5 + $0x20] sm:$0xff]  ;;  %s2917_s18 = scalar_lea.hbm %s2972_s10, %s1903_s30 }
 0xa16   : > { %v2049_v48 = vpack.c.bf16 %v1155_v47, %v1154_v36 }
 0xa91   : > { %v1075_v38 = vpop.xlane.xlu1 %1074 }
 0xa92   : > { %2216 = vrcp.f32 %v1075_v38  ;;  %v1496_v38 = vld [vmem:[%s2967_s5 + $0x70] sm:$0xff] }
 0xa95   : > { %v1079_v44 = vpop.permute.xlu1 %1078 }
 0xa96   : > { %2002 = vmatpush3.msra.mxu1 %v1079_v44  ;;  %2019 = vmatpush3.msra.mxu0 %v1079_v44  ;;  %v1584_v44 = vld [vmem:[%s2968_s6 + $0x60] sm:$0xff] }
 0xa97   : > { %2021 = vmatmul.mubr.msk.f32.vlgmr.msra.gmra.mrb[2].mxu0 %vm587_vm5, %v1316_v43  ;;  %2048 = vmatprep.subr.bf16.mxu1 %v2362_v6  ;;  %v2068_v43 = vpack.c.bf16 %v1496_v38, %v1494_v27 }
 0xa98   : > { %1565 = vmatprep.mubr.f32.mxu0 %v2364_v12 }
 0xa9c   : > { %v2217_v45 = vpop.eup %2216 }
 0xa9d   : > { %v1077_v46 = vmul.f32 %v2217_v45, %v2213_v40  ;;  %v2066_v40 = vpack.c.bf16 %v1497_v37, %v1495_v35  ;;  %v1586_v45 = vld [vmem:[%s2968_s6 + $0x70] sm:$0xff] }
 0xa9f   : > { %2004 = vmatmul.mubr.msk.f32.vlgmr.msra.gmra.mrb[14].mxu1 %vm587_vm5, %v1077_v46  ;;  %v2084_v46 = vpack.c.bf16 %v1586_v45, %v1584_v44 }
 0xaa0   : > { %2010 = vmatprep.mubr.msk.f32.mxu1 %vm2363_vm1, %v2364_v12  ;;  %2050 = vmatpush3.bf16.msra.mxu1 %v2049_v48 }
 0xaa1   : > { %2051 = vmatprep.subr.bf16.mxu1 %v2362_v6 }
 0xb6a   : > { %v1386_v49 = vpop.f32.mrb[2].mxu0 }
 0xb6b   : > { %v2022_v50 = vpop.f32.mrb[3].mxu0 }
 0xb6c   : > { %v1676_v50 = vld [vmem:[%s2969_s7 + $0x8] sm:$0xff] }
 0xb72   : > { %v1150_v54 = vpop.f32.mrb[14].mxu1 }
 0xb73   : > { %v2005_v55 = vpop.f32.mrb[15].mxu1  ;;  %2011 = vmatmul.mubr.msk.f32.vlgmr.msra.gmra.mrb[6].mxu1 %vm510_vm3, %v1150_v54 }
 0xb74   : > { %2053 = vmatpush3.bf16.msra.mxu1 %v2052_v53  ;;  %2027 = vmatprep.mubr.msk.f32.mxu1 %vm2363_vm1, %v2364_v12 }
 0xb7b   : > { %2028 = vmatmul.mubr.msk.f32.vlgmr.msra.gmra.mrb[6].mxu1 %vm510_vm3, %v1386_v49  ;;  %v1675_v49 = vld [vmem:[%s2969_s7] sm:$0xff] }
 0xb7c   : > { %1652 = vmatprep.mubr.f32.mxu1 %v2364_v12  ;;  %v2054_v12 = vpack.c.bf16 %v1485_v62, %v1483_v61  ;;  %v2087_v54 = vpack.c.bf16 %v1676_v50, %v1675_v49  ;;  %v1680_v61 = vld [vmem:[%s2969_s7 + $0x28] sm:$0xff] }
 0xb7e   : > { %2055 = vmatprep.subr.bf16.mxu0 %v2054_v12  ;;  %v1682_v12 = vld [vmem:[%s2969_s7 + $0x38] sm:$0xff] }
 0xb7f   : > { %2057 = vmatpush1.bf16.msra.mxu0 %v2056_v4  ;;  %v1685_v4 = vld [vmem:[%s2969_s7 + $0x50] sm:$0xff] }
 0xb80   : > { %2059 = vmatprep.subr.bf16.mxu0 %v2058_v13  ;;  %v2102_v7 = vpack.c.bf16 %v1686_v5, %v1685_v4  ;;  %v1690_v13 = vld [vmem:[%s2969_s7 + $0x78] sm:$0xff] }
 0xb81   : > { %v2108_v14 = vpack.c.bf16 %v1690_v13, %v1689_v11 }
 0xb83   : > { %2061 = vmatpush1.bf16.msra.mxu0 %v2060_v18  ;;  %v1693_v18 = vld [vmem:[%s2969_s7 + $0x90] sm:$0xff] }
 0xb84   : > { %2063 = vmatprep.subr.bf16.mxu0 %v2062_v25  ;;  %v2114_v20 = vpack.c.bf16 %v1694_v19, %v1693_v18  ;;  %v1698_v25 = vld [vmem:[%s2969_s7 + $0xb8] sm:$0xff] }
 0xb85   : > { %v2120_v26 = vpack.c.bf16 %v1698_v25, %v1697_v24 }
 0xb87   : > { %2065 = vmatpush1.bf16.msra.mxu0 %v2064_v31 }
 0xb88   : > { %2067 = vmatprep.subr.bf16.mxu0 %v2066_v40 }
 0xb8b   : > { %2069 = vmatpush1.bf16.msra.mxu0 %v2068_v43 }
 0xb8c   : > { %2086 = vmatprep.subr.bf16.mxu0 %v2362_v6 }
 0xc4e   : > { %v1461_v56 = vpop.f32.mrb[6].mxu1 }
 0xc4f   : > { %v2718_v57 = vadd.f32 %v1461_v56, %v2580_v0  ;;  %v2029_v58 = vpop.f32.mrb[7].mxu1  ;;  %v1573_v0 = vld [vmem:[%s2968_s6 + $0x8] sm:$0xff]  ;;  %v1677_v56 = vld [vmem:[%s2969_s7 + $0x10] sm:$0xff] }
 0xc50   : > { %v2070_v3 = vpack.c.bf16 %v1575_v63, %v1573_v0  ;;  %v1678_v58 = vld [vmem:[%s2969_s7 + $0x18] sm:$0xff]  ;;  %v1681_v0 = vld [vmem:[%s2969_s7 + $0x30] sm:$0xff] }
 0xc51   : > { %v1466_v59 = vmul.f32 %v2718_v57, %v2718_v57  ;;  %v2096_v63 = vpack.c.bf16 %v1682_v12, %v1681_v0 }
 0xc52   : > { %2071 = vmatprep.subr.bf16.mxu1 %v2070_v3  ;;  %v2099_v3 = vpack.c.bf16 %v1684_v2, %v1683_v1 }
 0xc53   : > { %v1467_v60 = vsel %vm392_vm0, %v1466_v59, 0.0  ;;  %2073 = vmatpush1.bf16.msra.mxu1 %v2072_v8  ;;  %v2090_v59 = vpack.c.bf16 %v1678_v58, %v1677_v56  ;;  %v1687_v8 = vld [vmem:[%s2969_s7 + $0x60] sm:$0xff] }
 0xc54   : > { %1468 = vadd.xlane.f32.xlu0 %v1467_v60  ;;  %2075 = vmatprep.subr.bf16.mxu1 %v2074_v17  ;;  %v1679_v60 = vld [vmem:[%s2969_s7 + $0x20] sm:$0xff]  ;;  %v2105_v10 = vpack.c.bf16 %v1688_v9, %v1687_v8  ;;  %v2111_v17 = vpack.c.bf16 %v1692_v16, %v1691_v15 }
 0xc55   : > { %v2093_v62 = vpack.c.bf16 %v1680_v61, %v1679_v60 }
 0xc57   : > { %2077 = vmatpush1.bf16.msra.mxu1 %v2076_v21  ;;  %v1695_v21 = vld [vmem:[%s2969_s7 + $0xa0] sm:$0xff] }
 0xc58   : > { %2079 = vmatprep.subr.bf16.mxu1 %v2078_v30  ;;  %v2117_v23 = vpack.c.bf16 %v1696_v22, %v1695_v21 }
 0xc5b   : > { %2081 = vmatpush1.bf16.msra.mxu1 %v2080_v34 }
 0xc5c   : > { %2083 = vmatprep.subr.bf16.mxu1 %v2082_v42 }
 0xc5f   : > { %2085 = vmatpush1.bf16.msra.mxu1 %v2084_v46 }
 0xce1   : > { %v1469_v36 = vpop.xlane.xlu0 %1468 }
 0xce2   : > { %v1470_v47 = vmul.f32 0.015625, %v1469_v36 }
 0xce4   : > { %v1471_v48 = vadd.f32 1e-05, %v1470_v47 }
 0xce6   : > { %2218 = vrsqrt.f32 %v1471_v48 }
 0xcf0   : > { %v2219_v51 = vpop.eup %2218 }
 0xcf1   : > { %v1473_v53 = vmul.f32 %v2219_v51, %v2718_v57 }
 0xcf3   : > { %v1481_v55 = vmul.f32 %v1896_v52, %v1473_v53 }
 0xcf5   : > { %1897 = vmatmul.mubr.msk.f32.vlgmr.msra.gmra.mrb[4].mxu0 %vm392_vm0, %v1481_v55  ;;  %1898 = vmatmul.mubr.msk.f32.vlgmr.msra.gmra.mrb[16].mxu1 %vm392_vm0, %v1481_v55 }
 0xcf6   : > { %2088 = vmatpush1.bf16.msra.mxu0 %v2087_v54 }
 0xcf7   : > { %2089 = vmatprep.subr.bf16.mxu0 %v2362_v6 }
 0xcfa   : > { %2091 = vmatpush1.bf16.msra.mxu0 %v2090_v59 }
 0xcfb   : > { %2092 = vmatprep.subr.bf16.mxu0 %v2362_v6 }
 0xcfe   : > { %2094 = vmatpush1.bf16.msra.mxu0 %v2093_v62 }
 0xcff   : > { %2095 = vmatprep.subr.bf16.mxu0 %v2362_v6 }
 0xd02   : > { %2097 = vmatpush1.bf16.msra.mxu0 %v2096_v63 }
 0xd03   : > { %2098 = vmatprep.subr.bf16.mxu0 %v2362_v6 }
 0xd06   : > { %2100 = vmatpush1.bf16.msra.mxu0 %v2099_v3 }
 0xd07   : > { %2101 = vmatprep.subr.bf16.mxu0 %v2362_v6 }
 0xd0a   : > { %2103 = vmatpush1.bf16.msra.mxu0 %v2102_v7 }
 0xd0b   : > { %2104 = vmatprep.subr.bf16.mxu0 %v2362_v6 }
 0xd0e   : > { %2106 = vmatpush1.bf16.msra.mxu0 %v2105_v10 }
 0xd0f   : > { %2107 = vmatprep.subr.bf16.mxu0 %v2362_v6 }
 0xd12   : > { %2109 = vmatpush1.bf16.msra.mxu0 %v2108_v14 }
 0xd13   : > { %2110 = vmatprep.subr.bf16.mxu0 %v2362_v6 }
 0xd16   : > { %2112 = vmatpush1.bf16.msra.mxu0 %v2111_v17 }
 0xd17   : > { %2113 = vmatprep.subr.bf16.mxu0 %v2362_v6 }
 0xd1a   : > { %2115 = vmatpush1.bf16.msra.mxu0 %v2114_v20 }
 0xd1b   : > { %2116 = vmatprep.subr.bf16.mxu0 %v2362_v6 }
 0xd1e   : > { %2118 = vmatpush1.bf16.msra.mxu0 %v2117_v23 }
 0xd1f   : > { %2119 = vmatprep.subr.bf16.mxu0 %v2362_v6 }
 0xd22   : > { %2121 = vmatpush1.bf16.msra.mxu0 %v2120_v26 }
 0xdc8   : > { %v1567_v28 = vpop.f32.mrb[4].mxu0  ;;  %v1654_v29 = vpop.f32.mrb[16].mxu1 }
 0xdc9   : > { %v1899_v30 = vmul.f32 -1.442695, %v1567_v28  ;;  %v1569_v31 = vpop.f32.mrb[5].mxu0  ;;  %v1656_v32 = vpop.f32.mrb[17].mxu1 }
 0xdca   : > { %v1900_v33 = vmul.f32 -1.442695, %v1569_v31 }
 0xdcb   : > { %2220 = vpow2.f32 %v1899_v30 }
 0xdcc   : > { %2222 = vpow2.f32 %v1900_v33 }
 0xdd5   : > { %v2221_v6 = vpop.eup %2220 }
 0xdd6   : > { %v2223_v34 = vpop.eup %2222  ;;  %v1665_v35 = vadd.f32 1.0, %v2221_v6 }
 0xdd7   : > { %v1666_v37 = vadd.f32 1.0, %v2223_v34 }
 0xdd8   : > { %2224 = vrcp.f32 %v1665_v35 }
 0xdd9   : > { %2226 = vrcp.f32 %v1666_v37 }
 0xde2   : > { %v2225_v39 = vpop.eup %2224 }
 0xde3   : > { %v2227_v40 = vpop.eup %2226  ;;  %v1671_v41 = vmul.f32 %v2225_v39, %v1567_v28 }
 0xde4   : > { %v1672_v27 = vmul.f32 %v2227_v40, %v1569_v31 }
 0xde5   : > { %v1673_v38 = vmul.f32 %v1671_v41, %v1654_v29 }
 0xde6   : > { %v1674_v42 = vmul.f32 %v1672_v27, %v1656_v32 }
 0xde8   : > { %1901 = vmatprep.mubr.msk.f32.mxu0 %vm392_vm0, %v1674_v42 }
 0xde9   : > { %1767 = vmatmul.mubr.f32.vlgmr.msra.gmra.mrb[6].mxu0 %v1673_v38 }
 0xebc   : > { %v1768_v43 = vpop.f32.mrb[6].mxu0 }
 0xebd   : > { %v1772_v44 = vadd.f32 %v2718_v57, %v1768_v43  ;;  %v1770_v45 = vpop.f32.mrb[7].mxu0 }
 0xebf   : > { %1773 = vst.msk [vmem:[%s389_s19] sm:$0xff] %vm392_vm0, %v1772_v44 }
 0xec0   : > { %2299 = shalt.err (!%p2296_p7)
}
 0xec1   : > { %s2300_s29 = scalar_lea.hbm %s2917_s18, 128  ;;  %s2304_s21 = scalar_lea.hbm %s2972_s10, 256 }
 0xec2   : > { %p2301_p9 = scmp.ne.s32.totalorder %s2917_s18, %s2300_s29  ;;  %p2305_p0 = scmp.lt.u32.totalorder %s2917_s18, %s2972_s10 }
 0xec3   : > { %p2306_p11 = scmp.lt.u32.totalorder %s2304_s21, %s2300_s29  ;;  %p2308_p4 = scmp.lt.u32.totalorder %s2300_s29, %s2917_s18 }
 0xec4   : > { %p2302_p2 = pnand %p2301_p9, %p2521_p12 }
 0xec5   : > { %p2307_p1 = por %p2306_p11, %p2305_p0 }
 0xec6   : > { %p2303_p5 = pneg %p2302_p2 }
 0xec7   : > { %p2309_p6 = por %p2308_p4, %p2307_p1 }
 0xec9   : > { %p2310_p8 = pnand %p2309_p6, %p2303_p5 }
 0xecb   : > { %2313 = shalt.err (!%p2310_p8)
}
 0xecc   : > { %2135 = dma.vmem_to_hbm [thread:$0]  (%p2521_p12), %s2919_s26, 128, %s2917_s18, %s1775_s17  }
 0xecd PF: > { %s2994_s27 = sld [smem:[#allocation11_spill]]  ;;  %s2995_s28 = sld [smem:[#allocation12_spill]] }
 0xece   : > { %p2997_p13 = scmp.ge.s32.totalorder %s2356_s16, 2 }
 0xed3   : > { %s1800_s23 = sand.u32 1, %s2994_s27   ;;  %p2996_p10 = scmp.ne.s32.totalorder %s2995_s28, 0 }
 0xed4   : > { %s1801_s11 = scalar_lea.sflag [#allocation4], %s1800_s23 }
 0xed5   : > { %p2146_p3 = pnand %p2997_p13, %p2996_p10 }
 0xed7   : > { %2339 = dma.done.wait (!%p2146_p3), %s1801_s11, 128  }
 0xed8   : > { %2341 = vsyncadd (!%p2146_p3), %s1801_s11, 4294967168  ;;  %s2998_s16 = sld [smem:[#allocation13_spill]]  ;;  %s2999_s13 = smov %s2348_s14 }
 0xed9   : > { %s3000_s14 = smov %s2352_s15  ;;  %s3001_s15 = smov %s2517_s25 }
 0xede   : > { %p24_p7 = scmp.ge.s32.totalorder %s2998_s16, 4  }
 0xee0   :  { %26 = sbr.rel (!%p24_p7) target bundleno = 6 (0x6), region = 109 }
 0xee7   :  { %1806 = vsyncpa [#allocation3], 1 }
 0xee8   :  { %1808 = vsyncpa [#allocation3 + $0x1], 1 }
 0xee9   :  { %1809 = vsyncpa [#allocation6], 1 }
 0xeea   :  { %1810 = vsyncpa [#allocation4], 1 }
 0xeeb   :  { %1812 = vsyncpa [#allocation4 + $0x1], 1 }

</bundles_post_ra>
